<compile_context>
chip_gen: v7x
topology: tpu7x:2x2x1
jax: 0.10.0
libtpu: 0.0.40
codegen_flags: <defaults>
</compile_context>

<pallas_src>
import jax
import jax.numpy as jnp
from jax.experimental import pallas as pl
from jax.experimental.pallas import tpu as pltpu


_SUBLANE = 8            # vreg sublane count: minimum batch-tile granularity
_MAX_BATCH_TILE = 512   # >=512-row tiles reach ~85% of HBM roofline when streamed


def _round_up(n, m):
    return ((n + m - 1) // m) * m


def _cdiv(a, b):
    return (a + b - 1) // b


def _mxu_feature_multiple():
    """MXU-native feature padding: 256 on v6e/v7x (2x256^2 MXU), else 128."""
    try:
        kind = jax.devices()[0].device_kind.lower()
        if "v6" in kind or "v7" in kind:
            return 256
    except Exception:
        pass
    return 128


def make_actor_kernel(n_layers: int, negative_slope: float = 0.01):
    """Fused MLP kernel. Ref order: (x, w1, b1, w2, b2, ..., wn, bn, out)."""

    def kernel(*refs):
        x_ref = refs[0]
        o_ref = refs[-1]
        param_refs = refs[1:-1]

        h = x_ref[...].astype(jnp.float32)      # (TB, padded_in), f32 activations
        for i in range(n_layers):
            w = param_refs[2 * i][...]          # (pin, pout), f32 or bf16 (pre-cast at init)
            b = param_refs[2 * i + 1][...]      # (1, pout), f32
            # Cast the (small) activation tile to the stored weight dtype right
            # at the MXU input; weights are never re-cast in-kernel.  f32 acc.
            h = jnp.dot(h.astype(w.dtype), w, preferred_element_type=jnp.float32)
            h = h + b
            if i < n_layers - 1:
                # LeakyReLU(0.01): max(h, slope*h) -> no compare/select op.
                h = jnp.maximum(h, negative_slope * h)
            else:
                # Tanh on the output layer (EUP slot, effectively free).
                h = jnp.tanh(h)
        o_ref[...] = h.astype(o_ref.dtype)

    return kernel


def pad_actor_params(params, use_bf16=True, feature_multiple=None):
    """Zero-pad every feature dim to the MXU-native multiple and (optionally)
    pre-cast weights to bf16 ONCE so they are stored bf16 in HBM.

    Biases stay f32.  Call once at init; padding is numerically inert for
    this MLP (LeakyReLU/Tanh map 0 -> 0, padded bias entries are 0).
    """
    if feature_multiple is None:
        feature_multiple = _mxu_feature_multiple()
    w_dtype = jnp.bfloat16 if use_bf16 else jnp.float32
    padded = []
    for w, b in params:
        in_dim, out_dim = w.shape
        pin = _round_up(in_dim, feature_multiple)
        pout = _round_up(out_dim, feature_multiple)
        w_p = jnp.pad(w, ((0, pin - in_dim), (0, pout - out_dim))).astype(w_dtype)
        b_p = jnp.pad(b.reshape(1, -1),
                      ((0, 0), (0, pout - out_dim))).astype(jnp.float32)
        padded.append((w_p, b_p))
    return padded


def _pick_batch_tile(batch):
    """Balanced batch tiles: padded_batch tracks batch closely (no ~2x pad
    waste) and the grid gets >= 2 tiles when the batch is big enough so both
    v7x TensorCores receive work on the 'parallel' axis."""
    n_tiles = max(1, _cdiv(batch, _MAX_BATCH_TILE))
    if n_tiles == 1 and batch >= 2 * _SUBLANE:
        n_tiles = 2
    tb = _round_up(_cdiv(batch, n_tiles), _SUBLANE)
    padded_batch = _round_up(batch, tb)
    return tb, padded_batch


def actor_forward(x, padded_params, action_dim):
    """x: [batch, state_dim] f32; padded_params from pad_actor_params()."""
    n_layers = len(padded_params)
    batch, state_dim = x.shape
    padded_in = padded_params[0][0].shape[0]
    padded_out = padded_params[-1][0].shape[1]

    tb, padded_batch = _pick_batch_tile(batch)
    grid = (padded_batch // tb,)

    x_p = jnp.pad(x, ((0, padded_batch - batch), (0, padded_in - state_dim)))

    flat = []
    for w, b in padded_params:
        flat.extend([w, b])

    # Advisory cost hint so XLA schedules this call sensibly in the RL loop.
    flops = 2 * padded_batch * sum(w.shape[0] * w.shape[1]
                                   for w, _ in padded_params)
    bytes_accessed = int(
        x_p.size * x_p.dtype.itemsize
        + padded_batch * padded_out * x.dtype.itemsize
        + sum(w.size * w.dtype.itemsize + b.size * b.dtype.itemsize
              for w, b in padded_params))
    cost = pl.CostEstimate(flops=flops,
                           transcendentals=padded_batch * padded_out,
                           bytes_accessed=bytes_accessed)

    # Explicit scoped-VMEM budget: params (x2 headroom in case the
    # double-buffer fallback is taken) + double-buffered x/out tiles + f32
    # intermediates, with 1.5x slack.  Capped at v7x's 64 MiB physical VMEM.
    param_bytes = sum(w.size * w.dtype.itemsize + b.size * b.dtype.itemsize
                      for w, b in padded_params)
    max_feat = max(max(w.shape) for w, _ in padded_params)
    io_bytes = 2 * tb * (padded_in + padded_out) * x.dtype.itemsize
    interm_bytes = 2 * tb * max_feat * 4
    vmem_limit = int(1.5 * (2 * param_bytes + io_bytes + interm_bytes)) + (1 << 20)
    vmem_limit = max(vmem_limit, 8 << 20)
    vmem_limit = min(vmem_limit, 64 << 20)

    kernel = make_actor_kernel(n_layers)
    out_shape = jax.ShapeDtypeStruct((padded_batch, padded_out), x.dtype)
    out_spec = pl.BlockSpec((tb, padded_out), lambda i: (i, 0))
    compiler_params = pltpu.CompilerParams(
        # Batch tiles are independent: lets v7x's two TensorCores split them.
        dimension_semantics=("parallel",),
        vmem_limit_bytes=vmem_limit)

    def build(single_buffer_params):
        # x/out keep the default 2-deep pipeline (bump x to pl.Buffered(3)
        # only if profiling shows exposed activation DMA on v7x).
        in_specs = [pl.BlockSpec((tb, padded_in), lambda i: (i, 0))]
        for w, b in padded_params:
            if single_buffer_params:
                # Grid-invariant blocks: one VMEM buffer instead of two.
                in_specs.append(pl.BlockSpec(w.shape, lambda i: (0, 0),
                                             pipeline_mode=pl.Buffered(1)))
                in_specs.append(pl.BlockSpec(b.shape, lambda i: (0, 0),
                                             pipeline_mode=pl.Buffered(1)))
            else:
                in_specs.append(pl.BlockSpec(w.shape, lambda i: (0, 0)))
                in_specs.append(pl.BlockSpec(b.shape, lambda i: (0, 0)))
        return pl.pallas_call(
            kernel,
            out_shape=out_shape,
            grid=grid,
            in_specs=in_specs,
            out_specs=out_spec,
            compiler_params=compiler_params,
            cost_estimate=cost)

    try:
        out_padded = build(single_buffer_params=True)(x_p, *flat)
    except Exception:
        # Fallback if this JAX build rejects pipeline_mode for TPU pallas_call.
        out_padded = build(single_buffer_params=False)(x_p, *flat)

    # Slice away batch/feature padding.
    return out_padded[:batch, :action_dim]


def init_actor_params(key, state_dim, action_dim, hidden_dim):
    """Deterministic init mirroring nn.Linear's U(-1/sqrt(in), 1/sqrt(in))."""
    input_dims = [state_dim] + hidden_dim
    output_dims = hidden_dim + [action_dim]
    params = []
    for in_dim, out_dim in zip(input_dims, output_dims):
        key, kw, kb = jax.random.split(key, 3)
        bound = 1.0 / (in_dim ** 0.5)
        w = jax.random.uniform(
            kw, (in_dim, out_dim), jnp.float32, minval=-bound, maxval=bound)
        b = jax.random.uniform(
            kb, (1, out_dim), jnp.float32, minval=-bound, maxval=bound)
        params.append((w, b))
    return params


def actor_forward_ref(x, params):
    """Pure-JAX reference (unpadded, f32) for correctness checking."""
    h = x
    n = len(params)
    for i, (w, b) in enumerate(params):
        h = h @ w + b
        if i < n - 1:
            h = jnp.where(h > 0, h, 0.01 * h)
        else:
            h = jnp.tanh(h)
    return h


if __name__ == "__main__":
    # Small shapes consistent with the module's forward:
    #   state_dim=16, hidden_dim=[32, 32], action_dim=8, batch=2
    state_dim, action_dim = 16, 8
    hidden_dim = [32, 32]
    batch = 2

    key = jax.random.PRNGKey(0)
    key, kx = jax.random.split(key)
    x = jax.random.normal(kx, (batch, state_dim), jnp.float32)

    params = init_actor_params(key, state_dim, action_dim, hidden_dim)
    ref = actor_forward_ref(x, params)

    # Production path: weights pre-cast to bf16 once, f32 accumulation and
    # f32 elementwise (expected small precision loss -> looser tolerance).
    padded_bf16 = pad_actor_params(params, use_bf16=True)
    out_bf16 = jax.block_until_ready(actor_forward(x, padded_bf16, action_dim))
    assert out_bf16.shape == (batch, action_dim)
    assert jnp.allclose(out_bf16, ref, atol=3e-2, rtol=3e-2), "bf16 path mismatch"

    # Full-f32 path keeps the tight correctness tolerance.
    padded_f32 = pad_actor_params(params, use_bf16=False)
    out_f32 = jax.block_until_ready(actor_forward(x, padded_f32, action_dim))
    assert out_f32.shape == (batch, action_dim)
    assert jnp.allclose(out_f32, ref, atol=1e-5, rtol=1e-5), "f32 path mismatch"

    print("KERNEL_OK")
</pallas_src>

<mosaic_0001>
module attributes {stable_mosaic.version = 11 : i64} {
  func.func @kernel(%arg0: i32, %arg1: memref<8x128xf32, #tpu.memory_space<vmem>>, %arg2: memref<128x128xbf16, #tpu.memory_space<vmem>>, %arg3: memref<1x128xf32, #tpu.memory_space<vmem>>, %arg4: memref<128x128xbf16, #tpu.memory_space<vmem>>, %arg5: memref<1x128xf32, #tpu.memory_space<vmem>>, %arg6: memref<128x128xbf16, #tpu.memory_space<vmem>>, %arg7: memref<1x128xf32, #tpu.memory_space<vmem>>, %arg8: memref<8x128xf32, #tpu.memory_space<vmem>>) attributes {dimension_semantics = [#tpu.dimension_semantics<parallel>], iteration_bounds = array<i64: 1>, scalar_prefetch = 0 : i64, scratch_operands = 0 : i64, tpu.core_type = #tpu.core_type<tc>, window_params = [{transform_indices = @transform_0, window_bounds = array<i64: 8, 128>}, {pipeline_mode = #tpu.pipeline_mode<synchronous>, transform_indices = @transform_1, window_bounds = array<i64: 128, 128>}, {pipeline_mode = #tpu.pipeline_mode<synchronous>, transform_indices = @transform_2, window_bounds = array<i64: 1, 128>}, {pipeline_mode = #tpu.pipeline_mode<synchronous>, transform_indices = @transform_3, window_bounds = array<i64: 128, 128>}, {pipeline_mode = #tpu.pipeline_mode<synchronous>, transform_indices = @transform_4, window_bounds = array<i64: 1, 128>}, {pipeline_mode = #tpu.pipeline_mode<synchronous>, transform_indices = @transform_5, window_bounds = array<i64: 128, 128>}, {pipeline_mode = #tpu.pipeline_mode<synchronous>, transform_indices = @transform_6, window_bounds = array<i64: 1, 128>}, {transform_indices = @transform_7, window_bounds = array<i64: 8, 128>}]} {
    %c0 = arith.constant 0 : index
    %c0_0 = arith.constant 0 : index
    %0 = vector.load %arg1[%c0, %c0_0] : memref<8x128xf32, #tpu.memory_space<vmem>>, vector<8x128xf32>
    %c0_1 = arith.constant 0 : index
    %c0_2 = arith.constant 0 : index
    %1 = vector.load %arg2[%c0_1, %c0_2] : memref<128x128xbf16, #tpu.memory_space<vmem>>, vector<128x128xbf16>
    %c0_3 = arith.constant 0 : index
    %c0_4 = arith.constant 0 : index
    %2 = vector.load %arg3[%c0_3, %c0_4] : memref<1x128xf32, #tpu.memory_space<vmem>>, vector<1x128xf32>
    %3 = arith.truncf %0 : vector<8x128xf32> to vector<8x128xbf16>
    %cst = arith.constant dense<0.000000e+00> : vector<8x128xf32>
    %4 = tpu.matmul %3, %1, %cst {dimension_numbers = #tpu.dot_dimension_numbers<[1], [0], [0], [1], [0, 0, 1, 1], [], []>} : vector<8x128xbf16>, vector<128x128xbf16>, vector<8x128xf32> -> vector<8x128xf32>
    %5 = vector.broadcast %2 : vector<1x128xf32> to vector<8x128xf32>
    %6 = arith.addf %4, %5 : vector<8x128xf32>
    %cst_5 = arith.constant 0.00999999977 : f32
    %7 = vector.broadcast %cst_5 : f32 to vector<8x128xf32>
    %8 = arith.mulf %7, %6 : vector<8x128xf32>
    %9 = arith.maximumf %6, %8 : vector<8x128xf32>
    %c0_6 = arith.constant 0 : index
    %c0_7 = arith.constant 0 : index
    %10 = vector.load %arg4[%c0_6, %c0_7] : memref<128x128xbf16, #tpu.memory_space<vmem>>, vector<128x128xbf16>
    %c0_8 = arith.constant 0 : index
    %c0_9 = arith.constant 0 : index
    %11 = vector.load %arg5[%c0_8, %c0_9] : memref<1x128xf32, #tpu.memory_space<vmem>>, vector<1x128xf32>
    %12 = arith.truncf %9 : vector<8x128xf32> to vector<8x128xbf16>
    %cst_10 = arith.constant dense<0.000000e+00> : vector<8x128xf32>
    %13 = tpu.matmul %12, %10, %cst_10 {dimension_numbers = #tpu.dot_dimension_numbers<[1], [0], [0], [1], [0, 0, 1, 1], [], []>} : vector<8x128xbf16>, vector<128x128xbf16>, vector<8x128xf32> -> vector<8x128xf32>
    %14 = vector.broadcast %11 : vector<1x128xf32> to vector<8x128xf32>
    %15 = arith.addf %13, %14 : vector<8x128xf32>
    %cst_11 = arith.constant 0.00999999977 : f32
    %16 = vector.broadcast %cst_11 : f32 to vector<8x128xf32>
    %17 = arith.mulf %16, %15 : vector<8x128xf32>
    %18 = arith.maximumf %15, %17 : vector<8x128xf32>
    %c0_12 = arith.constant 0 : index
    %c0_13 = arith.constant 0 : index
    %19 = vector.load %arg6[%c0_12, %c0_13] : memref<128x128xbf16, #tpu.memory_space<vmem>>, vector<128x128xbf16>
    %c0_14 = arith.constant 0 : index
    %c0_15 = arith.constant 0 : index
    %20 = vector.load %arg7[%c0_14, %c0_15] : memref<1x128xf32, #tpu.memory_space<vmem>>, vector<1x128xf32>
    %21 = arith.truncf %18 : vector<8x128xf32> to vector<8x128xbf16>
    %cst_16 = arith.constant dense<0.000000e+00> : vector<8x128xf32>
    %22 = tpu.matmul %21, %19, %cst_16 {dimension_numbers = #tpu.dot_dimension_numbers<[1], [0], [0], [1], [0, 0, 1, 1], [], []>} : vector<8x128xbf16>, vector<128x128xbf16>, vector<8x128xf32> -> vector<8x128xf32>
    %23 = vector.broadcast %20 : vector<1x128xf32> to vector<8x128xf32>
    %24 = arith.addf %22, %23 : vector<8x128xf32>
    %25 = math.tanh %24 : vector<8x128xf32>
    %c0_17 = arith.constant 0 : index
    %c0_18 = arith.constant 0 : index
    %26 = vector.load %arg8[%c0_17, %c0_18] : memref<8x128xf32, #tpu.memory_space<vmem>>, vector<8x128xf32>
    tpu.vector_store %arg8[%c0_17, %c0_18], %25 {strides = array<i32>} : memref<8x128xf32, #tpu.memory_space<vmem>>, vector<8x128xf32>,
    return
  }
  func.func @transform_0(%arg0: i32) -> (i32, i32) {
    %c0_i32 = arith.constant 0 : i32
    %c0_i32_0 = arith.constant 0 : i32
    return %arg0, %c0_i32 : i32, i32
  }
  func.func @transform_1(%arg0: i32) -> (i32, i32) {
    %c0_i32 = arith.constant 0 : i32
    %c0_i32_0 = arith.constant 0 : i32
    %c0_i32_1 = arith.constant 0 : i32
    return %c0_i32, %c0_i32_0 : i32, i32
  }
  func.func @transform_2(%arg0: i32) -> (i32, i32) {
    %c0_i32 = arith.constant 0 : i32
    %c0_i32_0 = arith.constant 0 : i32
    %c0_i32_1 = arith.constant 0 : i32
    return %c0_i32, %c0_i32_0 : i32, i32
  }
  func.func @transform_3(%arg0: i32) -> (i32, i32) {
    %c0_i32 = arith.constant 0 : i32
    %c0_i32_0 = arith.constant 0 : i32
    %c0_i32_1 = arith.constant 0 : i32
    return %c0_i32, %c0_i32_0 : i32, i32
  }
  func.func @transform_4(%arg0: i32) -> (i32, i32) {
    %c0_i32 = arith.constant 0 : i32
    %c0_i32_0 = arith.constant 0 : i32
    %c0_i32_1 = arith.constant 0 : i32
    return %c0_i32, %c0_i32_0 : i32, i32
  }
  func.func @transform_5(%arg0: i32) -> (i32, i32) {
    %c0_i32 = arith.constant 0 : i32
    %c0_i32_0 = arith.constant 0 : i32
    %c0_i32_1 = arith.constant 0 : i32
    return %c0_i32, %c0_i32_0 : i32, i32
  }
  func.func @transform_6(%arg0: i32) -> (i32, i32) {
    %c0_i32 = arith.constant 0 : i32
    %c0_i32_0 = arith.constant 0 : i32
    %c0_i32_1 = arith.constant 0 : i32
    return %c0_i32, %c0_i32_0 : i32, i32
  }
  func.func @transform_7(%arg0: i32) -> (i32, i32) {
    %c0_i32 = arith.constant 0 : i32
    %c0_i32_0 = arith.constant 0 : i32
    return %arg0, %c0_i32 : i32, i32
  }
}

module attributes {stable_mosaic.version = 11 : i64} {
  func.func @kernel(%arg0: i32, %arg1: memref<8x128xf32, #tpu.memory_space<vmem>>, %arg2: memref<128x128xbf16, #tpu.memory_space<vmem>>, %arg3: memref<1x128xf32, #tpu.memory_space<vmem>>, %arg4: memref<128x128xbf16, #tpu.memory_space<vmem>>, %arg5: memref<1x128xf32, #tpu.memory_space<vmem>>, %arg6: memref<128x128xbf16, #tpu.memory_space<vmem>>, %arg7: memref<1x128xf32, #tpu.memory_space<vmem>>, %arg8: memref<8x128xf32, #tpu.memory_space<vmem>>) attributes {dimension_semantics = [#tpu.dimension_semantics<parallel>], iteration_bounds = array<i64: 1>, scalar_prefetch = 0 : i64, scratch_operands = 0 : i64, tpu.core_type = #tpu.core_type<tc>, window_params = [{transform_indices = @transform_0, window_bounds = array<i64: 8, 128>}, {pipeline_mode = #tpu.pipeline_mode<synchronous>, transform_indices = @transform_1, window_bounds = array<i64: 128, 128>}, {pipeline_mode = #tpu.pipeline_mode<synchronous>, transform_indices = @transform_2, window_bounds = array<i64: 1, 128>}, {pipeline_mode = #tpu.pipeline_mode<synchronous>, transform_indices = @transform_3, window_bounds = array<i64: 128, 128>}, {pipeline_mode = #tpu.pipeline_mode<synchronous>, transform_indices = @transform_4, window_bounds = array<i64: 1, 128>}, {pipeline_mode = #tpu.pipeline_mode<synchronous>, transform_indices = @transform_5, window_bounds = array<i64: 128, 128>}, {pipeline_mode = #tpu.pipeline_mode<synchronous>, transform_indices = @transform_6, window_bounds = array<i64: 1, 128>}, {transform_indices = @transform_7, window_bounds = array<i64: 8, 128>}]} {
    %c0 = arith.constant 0 : index
    %c0_0 = arith.constant 0 : index
    %0 = vector.load %arg1[%c0, %c0_0] : memref<8x128xf32, #tpu.memory_space<vmem>>, vector<8x128xf32>
    %c0_1 = arith.constant 0 : index
    %c0_2 = arith.constant 0 : index
    %1 = vector.load %arg2[%c0_1, %c0_2] : memref<128x128xbf16, #tpu.memory_space<vmem>>, vector<128x128xbf16>
    %c0_3 = arith.constant 0 : index
    %c0_4 = arith.constant 0 : index
    %2 = vector.load %arg3[%c0_3, %c0_4] : memref<1x128xf32, #tpu.memory_space<vmem>>, vector<1x128xf32>
    %3 = arith.truncf %0 : vector<8x128xf32> to vector<8x128xbf16>
    %cst = arith.constant dense<0.000000e+00> : vector<8x128xf32>
    %4 = tpu.matmul %3, %1, %cst {dimension_numbers = #tpu.dot_dimension_numbers<[1], [0], [0], [1], [0, 0, 1, 1], [], []>} : vector<8x128xbf16>, vector<128x128xbf16>, vector<8x128xf32> -> vector<8x128xf32>
    %5 = vector.broadcast %2 : vector<1x128xf32> to vector<8x128xf32>
    %6 = arith.addf %4, %5 : vector<8x128xf32>
    %cst_5 = arith.constant 0.00999999977 : f32
    %7 = vector.broadcast %cst_5 : f32 to vector<8x128xf32>
    %8 = arith.mulf %7, %6 : vector<8x128xf32>
    %9 = arith.maximumf %6, %8 : vector<8x128xf32>
    %c0_6 = arith.constant 0 : index
    %c0_7 = arith.constant 0 : index
    %10 = vector.load %arg4[%c0_6, %c0_7] : memref<128x128xbf16, #tpu.memory_space<vmem>>, vector<128x128xbf16>
    %c0_8 = arith.constant 0 : index
    %c0_9 = arith.constant 0 : index
    %11 = vector.load %arg5[%c0_8, %c0_9] : memref<1x128xf32, #tpu.memory_space<vmem>>, vector<1x128xf32>
    %12 = arith.truncf %9 : vector<8x128xf32> to vector<8x128xbf16>
    %cst_10 = arith.constant dense<0.000000e+00> : vector<8x128xf32>
    %13 = tpu.matmul %12, %10, %cst_10 {dimension_numbers = #tpu.dot_dimension_numbers<[1], [0], [0], [1], [0, 0, 1, 1], [], []>} : vector<8x128xbf16>, vector<128x128xbf16>, vector<8x128xf32> -> vector<8x128xf32>
    %14 = vector.broadcast %11 : vector<1x128xf32> to vector<8x128xf32>
    %15 = arith.addf %13, %14 : vector<8x128xf32>
    %cst_11 = arith.constant 0.00999999977 : f32
    %16 = vector.broadcast %cst_11 : f32 to vector<8x128xf32>
    %17 = arith.mulf %16, %15 : vector<8x128xf32>
    %18 = arith.maximumf %15, %17 : vector<8x128xf32>
    %c0_12 = arith.constant 0 : index
    %c0_13 = arith.constant 0 : index
    %19 = vector.load %arg6[%c0_12, %c0_13] : memref<128x128xbf16, #tpu.memory_space<vmem>>, vector<128x128xbf16>
    %c0_14 = arith.constant 0 : index
    %c0_15 = arith.constant 0 : index
    %20 = vector.load %arg7[%c0_14, %c0_15] : memref<1x128xf32, #tpu.memory_space<vmem>>, vector<1x128xf32>
    %21 = arith.truncf %18 : vector<8x128xf32> to vector<8x128xbf16>
    %cst_16 = arith.constant dense<0.000000e+00> : vector<8x128xf32>
    %22 = tpu.matmul %21, %19, %cst_16 {dimension_numbers = #tpu.dot_dimension_numbers<[1], [0], [0], [1], [0, 0, 1, 1], [], []>} : vector<8x128xbf16>, vector<128x128xbf16>, vector<8x128xf32> -> vector<8x128xf32>
    %23 = vector.broadcast %20 : vector<1x128xf32> to vector<8x128xf32>
    %24 = arith.addf %22, %23 : vector<8x128xf32>
    %25 = math.tanh %24 : vector<8x128xf32>
    %c0_17 = arith.constant 0 : index
    %c0_18 = arith.constant 0 : index
    %26 = vector.load %arg8[%c0_17, %c0_18] : memref<8x128xf32, #tpu.memory_space<vmem>>, vector<8x128xf32>
    tpu.vector_store %arg8[%c0_17, %c0_18], %25 {strides = array<i32>} : memref<8x128xf32, #tpu.memory_space<vmem>>, vector<8x128xf32>,
    return
  }
  func.func @transform_0(%arg0: i32) -> (i32, i32) {
    %c0_i32 = arith.constant 0 : i32
    %c0_i32_0 = arith.constant 0 : i32
    return %arg0, %c0_i32 : i32, i32
  }
  func.func @transform_1(%arg0: i32) -> (i32, i32) {
    %c0_i32 = arith.constant 0 : i32
    %c0_i32_0 = arith.constant 0 : i32
    %c0_i32_1 = arith.constant 0 : i32
    return %c0_i32, %c0_i32_0 : i32, i32
  }
  func.func @transform_2(%arg0: i32) -> (i32, i32) {
    %c0_i32 = arith.constant 0 : i32
    %c0_i32_0 = arith.constant 0 : i32
    %c0_i32_1 = arith.constant 0 : i32
    return %c0_i32, %c0_i32_0 : i32, i32
  }
  func.func @transform_3(%arg0: i32) -> (i32, i32) {
    %c0_i32 = arith.constant 0 : i32
    %c0_i32_0 = arith.constant 0 : i32
    %c0_i32_1 = arith.constant 0 : i32
    return %c0_i32, %c0_i32_0 : i32, i32
  }
  func.func @transform_4(%arg0: i32) -> (i32, i32) {
    %c0_i32 = arith.constant 0 : i32
    %c0_i32_0 = arith.constant 0 : i32
    %c0_i32_1 = arith.constant 0 : i32
    return %c0_i32, %c0_i32_0 : i32, i32
  }
  func.func @transform_5(%arg0: i32) -> (i32, i32) {
    %c0_i32 = arith.constant 0 : i32
    %c0_i32_0 = arith.constant 0 : i32
    %c0_i32_1 = arith.constant 0 : i32
    return %c0_i32, %c0_i32_0 : i32, i32
  }
  func.func @transform_6(%arg0: i32) -> (i32, i32) {
    %c0_i32 = arith.constant 0 : i32
    %c0_i32_0 = arith.constant 0 : i32
    %c0_i32_1 = arith.constant 0 : i32
    return %c0_i32, %c0_i32_0 : i32, i32
  }
  func.func @transform_7(%arg0: i32) -> (i32, i32) {
    %c0_i32 = arith.constant 0 : i32
    %c0_i32_0 = arith.constant 0 : i32
    return %arg0, %c0_i32 : i32, i32
  }
}

</mosaic_0001>

<bundles_post_ra>
// kernel: tpu_custom_call.1
= control target key start
LH: loop header
LB: loop body
LE: loop exit
PB: predicated region body
PF: predicated region fallthrough
CT: control target
= control target key end

     0   :  { %12 = vsyncpa [#allocation3], 0  ;;  %s865_s0 = inlined_call_operand.hbm [shape: f32[8,128], index: 0, kind: input, shape index: {}]   ;;  %s866_s1 = inlined_call_operand.hbm [shape: bf16[128,128], index: 1, kind: input, shape index: {}]   ;;  %s867_s2 = inlined_call_operand.vmem [shape: f32[1,128], index: 2, kind: input, shape index: {}]   ;;  %s868_s3 = inlined_call_operand.hbm [shape: bf16[128,128], index: 3, kind: input, shape index: {}]   ;;  %s869_s4 = inlined_call_operand.vmem [shape: f32[1,128], index: 4, kind: input, shape index: {}]   ;;  %s870_s5 = inlined_call_operand.hbm [shape: bf16[128,128], index: 5, kind: input, shape index: {}]   ;;  %s871_s6 = inlined_call_operand.vmem [shape: f32[1,128], index: 6, kind: input, shape index: {}]   ;;  %s872_s7 = inlined_call_operand.hbm [shape: f32[8,128], index: 7, kind: output, shape index: {}]  }
   0x1   :  { %13 = vsyncpa [#allocation6], 0 }
   0x2   :  { %14 = vsyncpa [#allocation9], 0 }
   0x3   :  { %15 = vsyncpa [#allocation4], 0  ;;  %s708_s24 = smov [#allocation5]   ;;  %s590_s28 = scalar_lea.hbm %s866_s1, 1024 }
   0x4   :  { %s31_s25 = sshll.u32 %s708_s24, 4  ;;  %p591_p0 = scmp.ne.s32.totalorder %s866_s1, %s590_s28  ;;  %s32_s25 = int_to_ptr.vmem [resolvable:$true] %s31_s25 }
   0x5   :  { %p594_p1 = scmp.lt.u32.totalorder %s590_s28, %s866_s1 }
   0x7   :  { %p596_p2 = pnand %p594_p1, %p591_p0 }
   0x9   :  { %599 = shalt.err (!%p596_p2)
}
   0xa   :  { %s600_s10 = scalar_lea.vmem %s32_s25, 1024  ;;  %p605_p4 = scmp.lt.s32.totalorder %s32_s25, %s32_s25 }
   0xb   :  { %p601_p3 = scmp.ne.s32.totalorder %s32_s25, %s600_s10  ;;  %p606_p5 = scmp.lt.s32.totalorder %s600_s10, %s600_s10 }
   0xd   :  { %p607_p6 = por %p606_p5, %p605_p4 }
   0xf   :  { %p608_p7 = pnand %p607_p6, %p601_p3 }
  0x11   :  { %611 = shalt.err (!%p608_p7)
}
  0x12   :  { %s709_s11 = smov 64   ;;  %s710_s12 = smov 4  }
  0x13   :  { %37 = dma.hbm_to_vmem [thread:$0]  %s866_s1, 1024, %s32_s25, [#allocation6], %s709_s11, %s709_s11, %s710_s12  }
  0x14   :  { %s711_s15 = smov [#allocation2]   ;;  %s712_s17 = smov [#allocation7]  }
  0x15   :  { %s22_s16 = sshll.u32 %s711_s15, 4  ;;  %s45_s18 = sshll.u32 %s712_s17, 4  ;;  %s23_s16 = int_to_ptr.vmem [resolvable:$true] %s22_s16  ;;  %s46_s18 = int_to_ptr.vmem [resolvable:$true] %s45_s18 }
  0x16   :  { %s612_s21 = scalar_lea.hbm %s865_s0, 128 }
  0x17   :  { %p613_p8 = scmp.ne.s32.totalorder %s865_s0, %s612_s21  ;;  %p616_p9 = scmp.lt.u32.totalorder %s612_s21, %s865_s0 }
  0x19   :  { %p618_p10 = pnand %p616_p9, %p613_p8 }
  0x1b   :  { %621 = shalt.err (!%p618_p10)
}
  0x1c   :  { %s622_s1 = scalar_lea.vmem %s23_s16, 128  ;;  %p627_p12 = scmp.lt.s32.totalorder %s23_s16, %s23_s16 }
  0x1d   :  { %p623_p11 = scmp.ne.s32.totalorder %s23_s16, %s622_s1  ;;  %p628_p13 = scmp.lt.s32.totalorder %s622_s1, %s622_s1 }
  0x1f   :  { %p629_p0 = por %p628_p13, %p627_p12 }
  0x21   :  { %p630_p1 = pnand %p629_p0, %p623_p11 }
  0x23   :  { %633 = shalt.err (!%p630_p1)
}
  0x24   :  { %25 = dma.hbm_to_vmem [thread:$0]  %s865_s0, 128, %s23_s16, [#allocation3]  }
  0x25   :  { %s634_s30 = scalar_lea.hbm %s868_s3, 1024 }
  0x26   :  { %p635_p2 = scmp.ne.s32.totalorder %s868_s3, %s634_s30  ;;  %p638_p3 = scmp.lt.u32.totalorder %s634_s30, %s868_s3 }
  0x28   :  { %p640_p4 = pnand %p638_p3, %p635_p2 }
  0x2a   :  { %643 = shalt.err (!%p640_p4)
}
  0x2b   :  { %s644_s14 = scalar_lea.vmem %s46_s18, 1024  ;;  %p649_p6 = scmp.lt.s32.totalorder %s46_s18, %s46_s18 }
  0x2c   :  { %p645_p5 = scmp.ne.s32.totalorder %s46_s18, %s644_s14  ;;  %p650_p7 = scmp.lt.s32.totalorder %s644_s14, %s644_s14 }
  0x2e   :  { %p651_p8 = por %p650_p7, %p649_p6 }
  0x30   :  { %p652_p9 = pnand %p651_p8, %p645_p5 }
  0x32   :  { %655 = shalt.err (!%p652_p9)
}
  0x33   :  { %51 = dma.hbm_to_vmem [thread:$0]  %s868_s3, 1024, %s46_s18, [#allocation6], %s709_s11, %s709_s11, %s710_s12  }
  0x34   :  { %s713_s16 = smov [#allocation8]   ;;  %s656_s21 = scalar_lea.hbm %s870_s5, 1024 }
  0x35   :  { %s59_s17 = sshll.u32 %s713_s16, 4  ;;  %p657_p10 = scmp.ne.s32.totalorder %s870_s5, %s656_s21  ;;  %s60_s17 = int_to_ptr.vmem [resolvable:$true] %s59_s17 }
  0x36   :  { %p660_p11 = scmp.lt.u32.totalorder %s656_s21, %s870_s5 }
  0x38   :  { %p662_p12 = pnand %p660_p11, %p657_p10 }
  0x3a   :  { %665 = shalt.err (!%p662_p12)
}
  0x3b   :  { %s666_s1 = scalar_lea.vmem %s60_s17, 1024  ;;  %p671_p0 = scmp.lt.s32.totalorder %s60_s17, %s60_s17 }
  0x3c   :  { %p667_p13 = scmp.ne.s32.totalorder %s60_s17, %s666_s1  ;;  %p672_p1 = scmp.lt.s32.totalorder %s666_s1, %s666_s1 }
  0x3e   :  { %p673_p2 = por %p672_p1, %p671_p0 }
  0x40   :  { %p674_p3 = pnand %p673_p2, %p667_p13 }
  0x42   :  { %677 = shalt.err (!%p674_p3)
}
  0x43   :  { %65 = dma.hbm_to_vmem [thread:$0]  %s870_s5, 1024, %s60_s17, [#allocation9], %s709_s11, %s709_s11, %s710_s12  }
  0x44   :  { %700 = dma.done.wait [#allocation3], 128  }
  0x45   :  { %701 = vsyncadd [#allocation3], 4294967168 }
  0x46   :  { %702 = dma.done.wait [#allocation6], 2048  }
  0x47   :  { %703 = vsyncadd [#allocation6], 4294965248 }
  0x48   :  { %704 = dma.done.wait [#allocation9], 1024  }
  0x49   :  { %705 = vsyncadd [#allocation9], 4294966272  ;;  %v714_v0 = vmov 0.0   ;;  %vm715_vm0 = vmmov 0   ;;  %v564_v1 = vld [vmem:[#allocation5] sm:$0xff]   ;;  %v565_v2 = vld [vmem:[#allocation5 + $0x8] sm:$0xff]  }
  0x4a   :  { %495 = vmatprep.subr.bf16.mxu0 %v714_v0  ;;  %511 = vmatprep.mubr.msk.bf16.mxu0 %vm715_vm0, %v714_v0  ;;  %v566_v3 = vld [vmem:[#allocation5 + $0x10] sm:$0xff]   ;;  %v572_v4 = vld [vmem:[#allocation7] sm:$0xff]   ;;  %v567_v5 = vld [vmem:[#allocation5 + $0x18] sm:$0xff]  }
  0x4b   :  { %515 = vmatprep.subr.bf16.mxu1 %v714_v0  ;;  %531 = vmatprep.mubr.msk.bf16.mxu1 %vm715_vm0, %v714_v0  ;;  %v573_v6 = vld [vmem:[#allocation7 + $0x8] sm:$0xff]   ;;  %v568_v7 = vld [vmem:[#allocation5 + $0x20] sm:$0xff]   ;;  %v574_v8 = vld [vmem:[#allocation7 + $0x10] sm:$0xff]  }
  0x4c   :  { %496 = vmatpush3.bf16.msra.mxu0 %v564_v1  ;;  %516 = vmatpush3.bf16.msra.mxu1 %v572_v4  ;;  %v569_v9 = vld [vmem:[#allocation5 + $0x28] sm:$0xff]   ;;  %v575_v10 = vld [vmem:[#allocation7 + $0x18] sm:$0xff]   ;;  %v570_v11 = vld [vmem:[#allocation5 + $0x30] sm:$0xff]  }
  0x4d   :  { %497 = vmatprep.subr.bf16.mxu0 %v714_v0  ;;  %517 = vmatprep.subr.bf16.mxu1 %v714_v0  ;;  %v576_v12 = vld [vmem:[#allocation7 + $0x20] sm:$0xff]   ;;  %v571_v13 = vld [vmem:[#allocation5 + $0x38] sm:$0xff]   ;;  %v577_v15 = vld [vmem:[#allocation7 + $0x28] sm:$0xff]  }
  0x4e   :  { %v81_v14 = vld [vmem:[#allocation2] sm:$0xff]  ;;  %v578_v17 = vld [vmem:[#allocation7 + $0x30] sm:$0xff]   ;;  %v580_v19 = vld [vmem:[#allocation8] sm:$0xff]  }
  0x4f   :  { %v99_v16 = vpack.c.bf16 %v81_v14, %v81_v14  ;;  %v579_v18 = vld [vmem:[#allocation7 + $0x38] sm:$0xff]   ;;  %v581_v20 = vld [vmem:[#allocation8 + $0x8] sm:$0xff]   ;;  %v582_v21 = vld [vmem:[#allocation8 + $0x10] sm:$0xff]  }
  0x50   :  { %498 = vmatpush3.bf16.msra.mxu0 %v565_v2  ;;  %518 = vmatpush3.bf16.msra.mxu1 %v573_v6  ;;  %v583_v22 = vld [vmem:[#allocation8 + $0x18] sm:$0xff]   ;;  %v584_v23 = vld [vmem:[#allocation8 + $0x20] sm:$0xff]   ;;  %v585_v24 = vld [vmem:[#allocation8 + $0x28] sm:$0xff]  }
  0x51   :  { %499 = vmatprep.subr.bf16.mxu0 %v714_v0  ;;  %519 = vmatprep.subr.bf16.mxu1 %v714_v0  ;;  %v441_v25 = vld [vmem:[%s867_s2] ss:$0 sm:$0xff]  ;;  %v586_v34 = vld [vmem:[#allocation8 + $0x30] sm:$0xff]  }
  0x52   :  { %v587_v35 = vld [vmem:[#allocation8 + $0x38] sm:$0xff]  }
  0x53   :  { %v450_v36 = vld [vmem:[%s869_s4] ss:$0 sm:$0xff]  ;;  %s716_s4 = smov [#allocation10]  }
  0x54   :  { %500 = vmatpush3.bf16.msra.mxu0 %v566_v3  ;;  %520 = vmatpush3.bf16.msra.mxu1 %v574_v8  ;;  %v459_v45 = vld [vmem:[%s871_s6] ss:$0 sm:$0xff]  ;;  %s430_s28 = sshll.u32 %s716_s4, 4  ;;  %s431_s28 = int_to_ptr.vmem [resolvable:$true] %s430_s28 }
  0x55   :  { %501 = vmatprep.subr.bf16.mxu0 %v714_v0  ;;  %521 = vmatprep.subr.bf16.mxu1 %v714_v0  ;;  %s678_s29 = scalar_lea.vmem %s431_s28, 128  ;;  %p683_p5 = scmp.lt.s32.totalorder %s431_s28, %s431_s28 }
  0x56   :  { %p679_p4 = scmp.ne.s32.totalorder %s431_s28, %s678_s29  ;;  %p684_p6 = scmp.lt.s32.totalorder %s678_s29, %s678_s29 }
  0x58   :  { %502 = vmatpush3.bf16.msra.mxu0 %v567_v5  ;;  %522 = vmatpush3.bf16.msra.mxu1 %v575_v10  ;;  %p685_p7 = por %p684_p6, %p683_p5 }
  0x59   :  { %503 = vmatprep.subr.bf16.mxu0 %v714_v0  ;;  %523 = vmatprep.subr.bf16.mxu1 %v714_v0 }
  0x5a   :  { %p686_p8 = pnand %p685_p7, %p679_p4 }
  0x5c   :  { %504 = vmatpush3.bf16.msra.mxu0 %v568_v7  ;;  %524 = vmatpush3.bf16.msra.mxu1 %v576_v12 }
  0x5d   :  { %505 = vmatprep.subr.bf16.mxu0 %v714_v0  ;;  %525 = vmatprep.subr.bf16.mxu1 %v714_v0 }
  0x60   :  { %506 = vmatpush3.bf16.msra.mxu0 %v569_v9  ;;  %526 = vmatpush3.bf16.msra.mxu1 %v577_v15 }
  0x61   :  { %507 = vmatprep.subr.bf16.mxu0 %v714_v0  ;;  %527 = vmatprep.subr.bf16.mxu1 %v714_v0 }
  0x64   :  { %508 = vmatpush3.bf16.msra.mxu0 %v570_v11  ;;  %528 = vmatpush3.bf16.msra.mxu1 %v578_v17 }
  0x65   :  { %509 = vmatprep.subr.bf16.mxu0 %v714_v0  ;;  %529 = vmatprep.subr.bf16.mxu1 %v714_v0 }
  0x68   :  { %510 = vmatpush3.bf16.msra.mxu0 %v571_v13  ;;  %530 = vmatpush3.bf16.msra.mxu1 %v579_v18 }
  0x69   :  { %535 = vmatprep.subr.bf16.mxu0 %v714_v0 }
  0x6b   :  { %512 = vmatmul.mubr.bf16.vlgmr.msra.gmra.mrb[0].mxu0 %v99_v16 }
  0x6c   :  { %551 = vmatprep.mubr.msk.bf16.mxu0 %vm715_vm0, %v714_v0  ;;  %536 = vmatpush3.bf16.msra.mxu0 %v580_v19 }
  0x6d   :  { %537 = vmatprep.subr.bf16.mxu0 %v714_v0 }
  0x70   :  { %538 = vmatpush3.bf16.msra.mxu0 %v581_v20 }
  0x71   :  { %539 = vmatprep.subr.bf16.mxu0 %v714_v0 }
  0x74   :  { %540 = vmatpush3.bf16.msra.mxu0 %v582_v21 }
  0x75   :  { %541 = vmatprep.subr.bf16.mxu0 %v714_v0 }
  0x78   :  { %542 = vmatpush3.bf16.msra.mxu0 %v583_v22 }
  0x79   :  { %543 = vmatprep.subr.bf16.mxu0 %v714_v0 }
  0x7c   :  { %544 = vmatpush3.bf16.msra.mxu0 %v584_v23 }
  0x7d   :  { %545 = vmatprep.subr.bf16.mxu0 %v714_v0 }
  0x80   :  { %546 = vmatpush3.bf16.msra.mxu0 %v585_v24 }
  0x81   :  { %547 = vmatprep.subr.bf16.mxu0 %v714_v0 }
  0x84   :  { %548 = vmatpush3.bf16.msra.mxu0 %v586_v34 }
  0x85   :  { %549 = vmatprep.subr.bf16.mxu0 %v714_v0 }
  0x88   :  { %550 = vmatpush3.bf16.msra.mxu0 %v587_v35 }
 0x13e   :  { %v188_v26 = vpop.f32.mrb[0].mxu0 }
 0x13f   :  { %v189_v27 = vadd.f32 %v441_v25, %v188_v26  ;;  %v513_v28 = vpop.f32.mrb[1].mxu0 }
 0x140   :  { %v191_v29 = vpop.f32.mrb[2].mxu0 }
 0x141   :  { %v194_v30 = vmul.f32 0.01, %v189_v27  ;;  %v514_v31 = vpop.f32.mrb[3].mxu0 }
 0x143   :  { %v195_v32 = vmax.f32 %v189_v27, %v194_v30 }
 0x145   :  { %v213_v33 = vpack.c.bf16 %v195_v32, %v195_v32 }
 0x147   :  { %532 = vmatmul.mubr.bf16.vlgmr.msra.gmra.mrb[0].mxu1 %v213_v33 }
 0x21a   :  { %v302_v37 = vpop.f32.mrb[0].mxu1 }
 0x21b   :  { %v303_v38 = vadd.f32 %v450_v36, %v302_v37  ;;  %v533_v39 = vpop.f32.mrb[1].mxu1 }
 0x21c   :  { %v305_v40 = vpop.f32.mrb[2].mxu1 }
 0x21d   :  { %v308_v41 = vmul.f32 0.01, %v303_v38  ;;  %v534_v42 = vpop.f32.mrb[3].mxu1 }
 0x21f   :  { %v309_v43 = vmax.f32 %v303_v38, %v308_v41 }
 0x221   :  { %v327_v44 = vpack.c.bf16 %v309_v43, %v309_v43 }
 0x223   :  { %552 = vmatmul.mubr.bf16.vlgmr.msra.gmra.mrb[4].mxu0 %v327_v44 }
 0x2f6   :  { %v416_v46 = vpop.f32.mrb[4].mxu0 }
 0x2f7   :  { %v417_v47 = vadd.f32 %v459_v45, %v416_v46  ;;  %v553_v48 = vpop.f32.mrb[5].mxu0 }
 0x2f8   :  { %v419_v49 = vpop.f32.mrb[6].mxu0 }
 0x2f9   :  { %588 = vtanh.f32 %v417_v47  ;;  %v554_v50 = vpop.f32.mrb[7].mxu0 }
 0x303   :  { %v589_v51 = vpop.eup %588 }
 0x304   :  { %423 = vst [vmem:[#allocation10] sm:$0xff] %v589_v51 }
 0x305   :  { %689 = shalt.err (!%p686_p8)
}
 0x306   :  { %s690_s8 = scalar_lea.hbm %s872_s7, 128 }
 0x307   :  { %p691_p9 = scmp.ne.s32.totalorder %s872_s7, %s690_s8  ;;  %p694_p10 = scmp.lt.u32.totalorder %s690_s8, %s872_s7 }
 0x309   :  { %p696_p11 = pnand %p694_p10, %p691_p9 }
 0x30b   :  { %699 = shalt.err (!%p696_p11)
}
 0x30c   :  { %433 = dma.vmem_to_hbm [thread:$0]  %s431_s28, 128, %s872_s7, [#allocation4]  }
 0x30d   :  { %706 = dma.done.wait [#allocation4], 128  }
 0x30e   :  { %707 = vsyncadd [#allocation4], 4294967168 }
 0x30f   :  { %437 = vsyncpa [#allocation3], 1 }
 0x310   :  { %438 = vsyncpa [#allocation6], 1 }
 0x311   :  { %439 = vsyncpa [#allocation9], 1 }
 0x312   :  { %440 = vsyncpa [#allocation4], 1 }

// kernel: tpu_custom_call.1
= control target key start
LH: loop header
LB: loop body
LE: loop exit
PB: predicated region body
PF: predicated region fallthrough
CT: control target
= control target key end

     0   :  { %12 = vsyncpa [#allocation3], 0  ;;  %s865_s0 = inlined_call_operand.hbm [shape: f32[8,128], index: 0, kind: input, shape index: {}]   ;;  %s866_s1 = inlined_call_operand.hbm [shape: bf16[128,128], index: 1, kind: input, shape index: {}]   ;;  %s867_s2 = inlined_call_operand.vmem [shape: f32[1,128], index: 2, kind: input, shape index: {}]   ;;  %s868_s3 = inlined_call_operand.hbm [shape: bf16[128,128], index: 3, kind: input, shape index: {}]   ;;  %s869_s4 = inlined_call_operand.vmem [shape: f32[1,128], index: 4, kind: input, shape index: {}]   ;;  %s870_s5 = inlined_call_operand.hbm [shape: bf16[128,128], index: 5, kind: input, shape index: {}]   ;;  %s871_s6 = inlined_call_operand.vmem [shape: f32[1,128], index: 6, kind: input, shape index: {}]   ;;  %s872_s7 = inlined_call_operand.hbm [shape: f32[8,128], index: 7, kind: output, shape index: {}]  }
   0x1   :  { %13 = vsyncpa [#allocation6], 0 }
   0x2   :  { %14 = vsyncpa [#allocation9], 0 }
   0x3   :  { %15 = vsyncpa [#allocation4], 0  ;;  %s708_s24 = smov [#allocation5]   ;;  %s590_s28 = scalar_lea.hbm %s866_s1, 1024 }
   0x4   :  { %s31_s25 = sshll.u32 %s708_s24, 4  ;;  %p591_p0 = scmp.ne.s32.totalorder %s866_s1, %s590_s28  ;;  %s32_s25 = int_to_ptr.vmem [resolvable:$true] %s31_s25 }
   0x5   :  { %p594_p1 = scmp.lt.u32.totalorder %s590_s28, %s866_s1 }
   0x7   :  { %p596_p2 = pnand %p594_p1, %p591_p0 }
   0x9   :  { %599 = shalt.err (!%p596_p2)
}
   0xa   :  { %s600_s10 = scalar_lea.vmem %s32_s25, 1024  ;;  %p605_p4 = scmp.lt.s32.totalorder %s32_s25, %s32_s25 }
   0xb   :  { %p601_p3 = scmp.ne.s32.totalorder %s32_s25, %s600_s10  ;;  %p606_p5 = scmp.lt.s32.totalorder %s600_s10, %s600_s10 }
   0xd   :  { %p607_p6 = por %p606_p5, %p605_p4 }
   0xf   :  { %p608_p7 = pnand %p607_p6, %p601_p3 }
  0x11   :  { %611 = shalt.err (!%p608_p7)
}
  0x12   :  { %s709_s11 = smov 64   ;;  %s710_s12 = smov 4  }
  0x13   :  { %37 = dma.hbm_to_vmem [thread:$0]  %s866_s1, 1024, %s32_s25, [#allocation6], %s709_s11, %s709_s11, %s710_s12  }
  0x14   :  { %s711_s15 = smov [#allocation2]   ;;  %s712_s17 = smov [#allocation7]  }
  0x15   :  { %s22_s16 = sshll.u32 %s711_s15, 4  ;;  %s45_s18 = sshll.u32 %s712_s17, 4  ;;  %s23_s16 = int_to_ptr.vmem [resolvable:$true] %s22_s16  ;;  %s46_s18 = int_to_ptr.vmem [resolvable:$true] %s45_s18 }
  0x16   :  { %s612_s21 = scalar_lea.hbm %s865_s0, 128 }
  0x17   :  { %p613_p8 = scmp.ne.s32.totalorder %s865_s0, %s612_s21  ;;  %p616_p9 = scmp.lt.u32.totalorder %s612_s21, %s865_s0 }
  0x19   :  { %p618_p10 = pnand %p616_p9, %p613_p8 }
  0x1b   :  { %621 = shalt.err (!%p618_p10)
}
  0x1c   :  { %s622_s1 = scalar_lea.vmem %s23_s16, 128  ;;  %p627_p12 = scmp.lt.s32.totalorder %s23_s16, %s23_s16 }
  0x1d   :  { %p623_p11 = scmp.ne.s32.totalorder %s23_s16, %s622_s1  ;;  %p628_p13 = scmp.lt.s32.totalorder %s622_s1, %s622_s1 }
  0x1f   :  { %p629_p0 = por %p628_p13, %p627_p12 }
  0x21   :  { %p630_p1 = pnand %p629_p0, %p623_p11 }
  0x23   :  { %633 = shalt.err (!%p630_p1)
}
  0x24   :  { %25 = dma.hbm_to_vmem [thread:$0]  %s865_s0, 128, %s23_s16, [#allocation3]  }
  0x25   :  { %s634_s30 = scalar_lea.hbm %s868_s3, 1024 }
  0x26   :  { %p635_p2 = scmp.ne.s32.totalorder %s868_s3, %s634_s30  ;;  %p638_p3 = scmp.lt.u32.totalorder %s634_s30, %s868_s3 }
  0x28   :  { %p640_p4 = pnand %p638_p3, %p635_p2 }
  0x2a   :  { %643 = shalt.err (!%p640_p4)
}
  0x2b   :  { %s644_s14 = scalar_lea.vmem %s46_s18, 1024  ;;  %p649_p6 = scmp.lt.s32.totalorder %s46_s18, %s46_s18 }
  0x2c   :  { %p645_p5 = scmp.ne.s32.totalorder %s46_s18, %s644_s14  ;;  %p650_p7 = scmp.lt.s32.totalorder %s644_s14, %s644_s14 }
  0x2e   :  { %p651_p8 = por %p650_p7, %p649_p6 }
  0x30   :  { %p652_p9 = pnand %p651_p8, %p645_p5 }
  0x32   :  { %655 = shalt.err (!%p652_p9)
}
  0x33   :  { %51 = dma.hbm_to_vmem [thread:$0]  %s868_s3, 1024, %s46_s18, [#allocation6], %s709_s11, %s709_s11, %s710_s12  }
  0x34   :  { %s713_s16 = smov [#allocation8]   ;;  %s656_s21 = scalar_lea.hbm %s870_s5, 1024 }
  0x35   :  { %s59_s17 = sshll.u32 %s713_s16, 4  ;;  %p657_p10 = scmp.ne.s32.totalorder %s870_s5, %s656_s21  ;;  %s60_s17 = int_to_ptr.vmem [resolvable:$true] %s59_s17 }
  0x36   :  { %p660_p11 = scmp.lt.u32.totalorder %s656_s21, %s870_s5 }
  0x38   :  { %p662_p12 = pnand %p660_p11, %p657_p10 }
  0x3a   :  { %665 = shalt.err (!%p662_p12)
}
  0x3b   :  { %s666_s1 = scalar_lea.vmem %s60_s17, 1024  ;;  %p671_p0 = scmp.lt.s32.totalorder %s60_s17, %s60_s17 }
  0x3c   :  { %p667_p13 = scmp.ne.s32.totalorder %s60_s17, %s666_s1  ;;  %p672_p1 = scmp.lt.s32.totalorder %s666_s1, %s666_s1 }
  0x3e   :  { %p673_p2 = por %p672_p1, %p671_p0 }
  0x40   :  { %p674_p3 = pnand %p673_p2, %p667_p13 }
  0x42   :  { %677 = shalt.err (!%p674_p3)
}
  0x43   :  { %65 = dma.hbm_to_vmem [thread:$0]  %s870_s5, 1024, %s60_s17, [#allocation9], %s709_s11, %s709_s11, %s710_s12  }
  0x44   :  { %700 = dma.done.wait [#allocation3], 128  }
  0x45   :  { %701 = vsyncadd [#allocation3], 4294967168 }
  0x46   :  { %702 = dma.done.wait [#allocation6], 2048  }
  0x47   :  { %703 = vsyncadd [#allocation6], 4294965248 }
  0x48   :  { %704 = dma.done.wait [#allocation9], 1024  }
  0x49   :  { %705 = vsyncadd [#allocation9], 4294966272  ;;  %v714_v0 = vmov 0.0   ;;  %vm715_vm0 = vmmov 0   ;;  %v564_v1 = vld [vmem:[#allocation5] sm:$0xff]   ;;  %v565_v2 = vld [vmem:[#allocation5 + $0x8] sm:$0xff]  }
  0x4a   :  { %495 = vmatprep.subr.bf16.mxu0 %v714_v0  ;;  %511 = vmatprep.mubr.msk.bf16.mxu0 %vm715_vm0, %v714_v0  ;;  %v566_v3 = vld [vmem:[#allocation5 + $0x10] sm:$0xff]   ;;  %v572_v4 = vld [vmem:[#allocation7] sm:$0xff]   ;;  %v567_v5 = vld [vmem:[#allocation5 + $0x18] sm:$0xff]  }
  0x4b   :  { %515 = vmatprep.subr.bf16.mxu1 %v714_v0  ;;  %531 = vmatprep.mubr.msk.bf16.mxu1 %vm715_vm0, %v714_v0  ;;  %v573_v6 = vld [vmem:[#allocation7 + $0x8] sm:$0xff]   ;;  %v568_v7 = vld [vmem:[#allocation5 + $0x20] sm:$0xff]   ;;  %v574_v8 = vld [vmem:[#allocation7 + $0x10] sm:$0xff]  }
  0x4c   :  { %496 = vmatpush3.bf16.msra.mxu0 %v564_v1  ;;  %516 = vmatpush3.bf16.msra.mxu1 %v572_v4  ;;  %v569_v9 = vld [vmem:[#allocation5 + $0x28] sm:$0xff]   ;;  %v575_v10 = vld [vmem:[#allocation7 + $0x18] sm:$0xff]   ;;  %v570_v11 = vld [vmem:[#allocation5 + $0x30] sm:$0xff]  }
  0x4d   :  { %497 = vmatprep.subr.bf16.mxu0 %v714_v0  ;;  %517 = vmatprep.subr.bf16.mxu1 %v714_v0  ;;  %v576_v12 = vld [vmem:[#allocation7 + $0x20] sm:$0xff]   ;;  %v571_v13 = vld [vmem:[#allocation5 + $0x38] sm:$0xff]   ;;  %v577_v15 = vld [vmem:[#allocation7 + $0x28] sm:$0xff]  }
  0x4e   :  { %v81_v14 = vld [vmem:[#allocation2] sm:$0xff]  ;;  %v578_v17 = vld [vmem:[#allocation7 + $0x30] sm:$0xff]   ;;  %v580_v19 = vld [vmem:[#allocation8] sm:$0xff]  }
  0x4f   :  { %v99_v16 = vpack.c.bf16 %v81_v14, %v81_v14  ;;  %v579_v18 = vld [vmem:[#allocation7 + $0x38] sm:$0xff]   ;;  %v581_v20 = vld [vmem:[#allocation8 + $0x8] sm:$0xff]   ;;  %v582_v21 = vld [vmem:[#allocation8 + $0x10] sm:$0xff]  }
  0x50   :  { %498 = vmatpush3.bf16.msra.mxu0 %v565_v2  ;;  %518 = vmatpush3.bf16.msra.mxu1 %v573_v6  ;;  %v583_v22 = vld [vmem:[#allocation8 + $0x18] sm:$0xff]   ;;  %v584_v23 = vld [vmem:[#allocation8 + $0x20] sm:$0xff]   ;;  %v585_v24 = vld [vmem:[#allocation8 + $0x28] sm:$0xff]  }
  0x51   :  { %499 = vmatprep.subr.bf16.mxu0 %v714_v0  ;;  %519 = vmatprep.subr.bf16.mxu1 %v714_v0  ;;  %v441_v25 = vld [vmem:[%s867_s2] ss:$0 sm:$0xff]  ;;  %v586_v34 = vld [vmem:[#allocation8 + $0x30] sm:$0xff]  }
  0x52   :  { %v587_v35 = vld [vmem:[#allocation8 + $0x38] sm:$0xff]  }
  0x53   :  { %v450_v36 = vld [vmem:[%s869_s4] ss:$0 sm:$0xff]  ;;  %s716_s4 = smov [#allocation10]  }
  0x54   :  { %500 = vmatpush3.bf16.msra.mxu0 %v566_v3  ;;  %520 = vmatpush3.bf16.msra.mxu1 %v574_v8  ;;  %v459_v45 = vld [vmem:[%s871_s6] ss:$0 sm:$0xff]  ;;  %s430_s28 = sshll.u32 %s716_s4, 4  ;;  %s431_s28 = int_to_ptr.vmem [resolvable:$true] %s430_s28 }
  0x55   :  { %501 = vmatprep.subr.bf16.mxu0 %v714_v0  ;;  %521 = vmatprep.subr.bf16.mxu1 %v714_v0  ;;  %s678_s29 = scalar_lea.vmem %s431_s28, 128  ;;  %p683_p5 = scmp.lt.s32.totalorder %s431_s28, %s431_s28 }
  0x56   :  { %p679_p4 = scmp.ne.s32.totalorder %s431_s28, %s678_s29  ;;  %p684_p6 = scmp.lt.s32.totalorder %s678_s29, %s678_s29 }
  0x58   :  { %502 = vmatpush3.bf16.msra.mxu0 %v567_v5  ;;  %522 = vmatpush3.bf16.msra.mxu1 %v575_v10  ;;  %p685_p7 = por %p684_p6, %p683_p5 }
  0x59   :  { %503 = vmatprep.subr.bf16.mxu0 %v714_v0  ;;  %523 = vmatprep.subr.bf16.mxu1 %v714_v0 }
  0x5a   :  { %p686_p8 = pnand %p685_p7, %p679_p4 }
  0x5c   :  { %504 = vmatpush3.bf16.msra.mxu0 %v568_v7  ;;  %524 = vmatpush3.bf16.msra.mxu1 %v576_v12 }
  0x5d   :  { %505 = vmatprep.subr.bf16.mxu0 %v714_v0  ;;  %525 = vmatprep.subr.bf16.mxu1 %v714_v0 }
  0x60   :  { %506 = vmatpush3.bf16.msra.mxu0 %v569_v9  ;;  %526 = vmatpush3.bf16.msra.mxu1 %v577_v15 }
  0x61   :  { %507 = vmatprep.subr.bf16.mxu0 %v714_v0  ;;  %527 = vmatprep.subr.bf16.mxu1 %v714_v0 }
  0x64   :  { %508 = vmatpush3.bf16.msra.mxu0 %v570_v11  ;;  %528 = vmatpush3.bf16.msra.mxu1 %v578_v17 }
  0x65   :  { %509 = vmatprep.subr.bf16.mxu0 %v714_v0  ;;  %529 = vmatprep.subr.bf16.mxu1 %v714_v0 }
  0x68   :  { %510 = vmatpush3.bf16.msra.mxu0 %v571_v13  ;;  %530 = vmatpush3.bf16.msra.mxu1 %v579_v18 }
  0x69   :  { %535 = vmatprep.subr.bf16.mxu0 %v714_v0 }
  0x6b   :  { %512 = vmatmul.mubr.bf16.vlgmr.msra.gmra.mrb[0].mxu0 %v99_v16 }
  0x6c   :  { %551 = vmatprep.mubr.msk.bf16.mxu0 %vm715_vm0, %v714_v0  ;;  %536 = vmatpush3.bf16.msra.mxu0 %v580_v19 }
  0x6d   :  { %537 = vmatprep.subr.bf16.mxu0 %v714_v0 }
  0x70   :  { %538 = vmatpush3.bf16.msra.mxu0 %v581_v20 }
  0x71   :  { %539 = vmatprep.subr.bf16.mxu0 %v714_v0 }
  0x74   :  { %540 = vmatpush3.bf16.msra.mxu0 %v582_v21 }
  0x75   :  { %541 = vmatprep.subr.bf16.mxu0 %v714_v0 }
  0x78   :  { %542 = vmatpush3.bf16.msra.mxu0 %v583_v22 }
  0x79   :  { %543 = vmatprep.subr.bf16.mxu0 %v714_v0 }
  0x7c   :  { %544 = vmatpush3.bf16.msra.mxu0 %v584_v23 }
  0x7d   :  { %545 = vmatprep.subr.bf16.mxu0 %v714_v0 }
  0x80   :  { %546 = vmatpush3.bf16.msra.mxu0 %v585_v24 }
  0x81   :  { %547 = vmatprep.subr.bf16.mxu0 %v714_v0 }
  0x84   :  { %548 = vmatpush3.bf16.msra.mxu0 %v586_v34 }
  0x85   :  { %549 = vmatprep.subr.bf16.mxu0 %v714_v0 }
  0x88   :  { %550 = vmatpush3.bf16.msra.mxu0 %v587_v35 }
 0x13e   :  { %v188_v26 = vpop.f32.mrb[0].mxu0 }
 0x13f   :  { %v189_v27 = vadd.f32 %v441_v25, %v188_v26  ;;  %v513_v28 = vpop.f32.mrb[1].mxu0 }
 0x140   :  { %v191_v29 = vpop.f32.mrb[2].mxu0 }
 0x141   :  { %v194_v30 = vmul.f32 0.01, %v189_v27  ;;  %v514_v31 = vpop.f32.mrb[3].mxu0 }
 0x143   :  { %v195_v32 = vmax.f32 %v189_v27, %v194_v30 }
 0x145   :  { %v213_v33 = vpack.c.bf16 %v195_v32, %v195_v32 }
 0x147   :  { %532 = vmatmul.mubr.bf16.vlgmr.msra.gmra.mrb[0].mxu1 %v213_v33 }
 0x21a   :  { %v302_v37 = vpop.f32.mrb[0].mxu1 }
 0x21b   :  { %v303_v38 = vadd.f32 %v450_v36, %v302_v37  ;;  %v533_v39 = vpop.f32.mrb[1].mxu1 }
 0x21c   :  { %v305_v40 = vpop.f32.mrb[2].mxu1 }
 0x21d   :  { %v308_v41 = vmul.f32 0.01, %v303_v38  ;;  %v534_v42 = vpop.f32.mrb[3].mxu1 }
 0x21f   :  { %v309_v43 = vmax.f32 %v303_v38, %v308_v41 }
 0x221   :  { %v327_v44 = vpack.c.bf16 %v309_v43, %v309_v43 }
 0x223   :  { %552 = vmatmul.mubr.bf16.vlgmr.msra.gmra.mrb[4].mxu0 %v327_v44 }
 0x2f6   :  { %v416_v46 = vpop.f32.mrb[4].mxu0 }
 0x2f7   :  { %v417_v47 = vadd.f32 %v459_v45, %v416_v46  ;;  %v553_v48 = vpop.f32.mrb[5].mxu0 }
 0x2f8   :  { %v419_v49 = vpop.f32.mrb[6].mxu0 }
 0x2f9   :  { %588 = vtanh.f32 %v417_v47  ;;  %v554_v50 = vpop.f32.mrb[7].mxu0 }
 0x303   :  { %v589_v51 = vpop.eup %588 }
 0x304   :  { %423 = vst [vmem:[#allocation10] sm:$0xff] %v589_v51 }
 0x305   :  { %689 = shalt.err (!%p686_p8)
}
 0x306   :  { %s690_s8 = scalar_lea.hbm %s872_s7, 128 }
 0x307   :  { %p691_p9 = scmp.ne.s32.totalorder %s872_s7, %s690_s8  ;;  %p694_p10 = scmp.lt.u32.totalorder %s690_s8, %s872_s7 }
 0x309   :  { %p696_p11 = pnand %p694_p10, %p691_p9 }
 0x30b   :  { %699 = shalt.err (!%p696_p11)
}
 0x30c   :  { %433 = dma.vmem_to_hbm [thread:$0]  %s431_s28, 128, %s872_s7, [#allocation4]  }
 0x30d   :  { %706 = dma.done.wait [#allocation4], 128  }
 0x30e   :  { %707 = vsyncadd [#allocation4], 4294967168 }
 0x30f   :  { %437 = vsyncpa [#allocation3], 1 }
 0x310   :  { %438 = vsyncpa [#allocation6], 1 }
 0x311   :  { %439 = vsyncpa [#allocation9], 1 }
 0x312   :  { %440 = vsyncpa [#allocation4], 1 }

</bundles_post_ra>
